<compile_context>
chip_gen: v7x
topology: tpu7x:2x2x1
jax: 0.10.0
libtpu: 0.0.40
codegen_flags: <defaults>
</compile_context>

<pallas_src>
import jax
import jax.numpy as jnp
from jax.experimental import pallas as pl
from jax.experimental.pallas import tpu as pltpu

NUM_POSITIONS = 81  # fixed by the module (torch.randn(81, dimension))

_TARGET_BLOCK_BYTES = 8 << 20   # ~8 MiB x-block per grid step


def _embed_add_kernel(x_ref, pos_ref, o_ref):
    # x_ref: (TB, L)  streaming tile of the flattened input
    # pos_ref: (1, L) positional table (same block every step -> VMEM-resident)
    # o_ref: (TB, L)
    # The (1, L) -> (TB, L) sublane broadcast is trivially hidden under the
    # streaming DMA for this memory-bound kernel.
    o_ref[...] = x_ref[...] + pos_ref[...]


def _round_up(n, m):
    return ((n + m - 1) // m) * m


def _sublane_rows(dtype):
    # Sub-32-bit dtypes pack along sublanes (one vreg holds 8 f32 / 16 bf16 /
    # 32 int8 rows), so block heights should be multiples of the packing unit.
    return max(8, 32 // jnp.dtype(dtype).itemsize)


def _tpu_config():
    """(target_block_bytes, vmem_limit_bytes, num_cores), generation-gated."""
    vmem_bytes = 64 << 20   # conservative default (v7x per-TC VMEM)
    num_cores = 0
    try:
        info = pltpu.get_tpu_info()
        vmem_bytes = int(getattr(info, "vmem_capacity_bytes", vmem_bytes))
        num_cores = int(getattr(info, "num_cores", 0) or 0)
    except Exception:
        pass
    if num_cores <= 0:
        # v7x (64 MiB VMEM/TC) is the dual-TensorCore generation; the 128 MiB
        # parts (v5e/v6e) have a single TensorCore per chip.
        num_cores = 2 if vmem_bytes <= (96 << 20) else 1
    if vmem_bytes >= (100 << 20):       # v5e / v6e: 128 MiB physical VMEM
        vmem_limit = 64 << 20
    else:                               # v7x: 64 MiB per TensorCore
        vmem_limit = 40 << 20
    return _TARGET_BLOCK_BYTES, vmem_limit, num_cores


def _choose_row_tile(batch, row_bytes, sublane, target_block_bytes, num_cores):
    """Rows of x per grid step (sublane-aligned unless it covers all of B)."""
    tb = max(sublane, target_block_bytes // max(row_bytes, 1))
    min_parallel_rows = 2 * num_cores * sublane

    if tb >= batch:
        # The whole batch fits inside one target-sized block.
        if num_cores > 1 and batch >= min_parallel_rows:
            # >= 2 blocks per TensorCore: balanced split + intra-core
            # double-buffering instead of one exposed block per core.
            tb = _round_up(-(-batch // (2 * num_cores)), sublane)
            return min(tb, batch)
        return batch

    # Partial tiling: block height must be a multiple of the packing unit.
    tb = max(sublane, (tb // sublane) * sublane)
    n_steps = -(-batch // tb)
    if num_cores > 1:
        # Keep cores balanced: step count a multiple of the core count and at
        # least 2 blocks per core.
        n_steps = max(n_steps, 2 * num_cores)
        n_steps = _round_up(n_steps, num_cores)
        tb = max(sublane, _round_up(-(-batch // n_steps), sublane))
    return min(tb, batch)


def embedding_forward(x, target_position, *, donate_x=False):
    """x: (B, 81, D), target_position: (81, D) -> x + target_position.

    Set donate_x=True only when the caller donates x at its jit boundary
    (jax.jit(..., donate_argnums=...)); that aliases the output onto x to
    mirror PyTorch's in-place `x +=` without a second (B, 81, D) HBM buffer.
    Without donation, an alias would make XLA insert a defensive full copy of
    x (~2x HBM traffic), so the default is no alias.
    """
    B, P, D = x.shape
    assert P == NUM_POSITIONS and target_position.shape == (P, D)
    # PyTorch's in-place `x += param` requires matching dtypes; mirror that.
    assert target_position.dtype == x.dtype, (
        f"dtype mismatch: x={x.dtype} vs target_position={target_position.dtype}")

    L = P * D
    # Pad the flattened lane axis to a multiple of 128 so every store is an
    # unmasked lane-dense `vst` (no-op when D is already 128-aligned).
    L_pad = _round_up(L, 128)
    x2d = x.reshape(B, L)
    pos2d = target_position.reshape(1, L)
    if L_pad != L:
        x2d = jnp.pad(x2d, ((0, 0), (0, L_pad - L)))
        pos2d = jnp.pad(pos2d, ((0, 0), (0, L_pad - L)))

    target_block_bytes, vmem_limit, num_cores = _tpu_config()
    sublane = _sublane_rows(x.dtype)
    row_bytes = L_pad * jnp.dtype(x.dtype).itemsize
    TB = _choose_row_tile(B, row_bytes, sublane, target_block_bytes, num_cores)
    grid = (pl.cdiv(B, TB),)

    out2d = pl.pallas_call(
        _embed_add_kernel,
        out_shape=jax.ShapeDtypeStruct((B, L_pad), x.dtype),
        grid=grid,
        in_specs=[
            pl.BlockSpec((TB, L_pad), lambda i: (i, 0)),  # streaming x tiles
            pl.BlockSpec((1, L_pad), lambda i: (0, 0)),   # pos table, resident
        ],
        out_specs=pl.BlockSpec((TB, L_pad), lambda i: (i, 0)),
        input_output_aliases=({0: 0} if donate_x else {}),
        compiler_params=pltpu.CompilerParams(
            dimension_semantics=("parallel",),
            vmem_limit_bytes=vmem_limit,
        ),
    )(x2d, pos2d)

    if L_pad != L:
        out2d = out2d[:, :L]
    return out2d.reshape(B, P, D)


if __name__ == "__main__":
    key = jax.random.PRNGKey(0)
    k_x, k_pos, k_x2, k_pos2 = jax.random.split(key, 4)

    # Case 1: lane-aligned embedding dim (no padding path).
    batch, dimension = 2, 128
    x = jax.random.normal(k_x, (batch, NUM_POSITIONS, dimension), dtype=jnp.float32)
    target_position = jax.random.normal(
        k_pos, (NUM_POSITIONS, dimension), dtype=jnp.float32
    )  # deterministic stand-in for nn.Parameter(torch.randn(81, dimension))
    out = jax.block_until_ready(embedding_forward(x, target_position))
    ref = x + target_position[None, :, :]
    assert out.shape == x.shape
    assert jnp.allclose(out, ref, atol=1e-6), "mismatch vs reference (D=128)"

    # Case 2: non-128-aligned flattened axis (exercises the lane-padding path).
    batch2, dim2 = 5, 64  # 81*64 = 5184, not a multiple of 128
    x2 = jax.random.normal(k_x2, (batch2, NUM_POSITIONS, dim2), dtype=jnp.float32)
    pos2 = jax.random.normal(k_pos2, (NUM_POSITIONS, dim2), dtype=jnp.float32)
    out2 = jax.block_until_ready(embedding_forward(x2, pos2))
    ref2 = x2 + pos2[None, :, :]
    assert out2.shape == x2.shape
    assert jnp.allclose(out2, ref2, atol=1e-6), "mismatch vs reference (D=64)"

    print("KERNEL_OK")
</pallas_src>

<mosaic_0001>
module attributes {stable_mosaic.version = 11 : i64} {
  func.func @_embed_add_kernel(%arg0: i32, %arg1: memref<2x10368xf32, #tpu.memory_space<vmem>>, %arg2: memref<1x10368xf32, #tpu.memory_space<vmem>>, %arg3: memref<2x10368xf32, #tpu.memory_space<vmem>>) attributes {dimension_semantics = [#tpu.dimension_semantics<parallel>], iteration_bounds = array<i64: 1>, scalar_prefetch = 0 : i64, scratch_operands = 0 : i64, tpu.core_type = #tpu.core_type<tc>, window_params = [{transform_indices = @transform_0, window_bounds = array<i64: 2, 10368>}, {pipeline_mode = #tpu.pipeline_mode<synchronous>, transform_indices = @transform_1, window_bounds = array<i64: 1, 10368>}, {transform_indices = @transform_2, window_bounds = array<i64: 2, 10368>}]} {
    %c0 = arith.constant 0 : index
    %c0_0 = arith.constant 0 : index
    %0 = vector.load %arg1[%c0, %c0_0] : memref<2x10368xf32, #tpu.memory_space<vmem>>, vector<2x10368xf32>
    %c0_1 = arith.constant 0 : index
    %c0_2 = arith.constant 0 : index
    %1 = vector.load %arg2[%c0_1, %c0_2] : memref<1x10368xf32, #tpu.memory_space<vmem>>, vector<1x10368xf32>
    %2 = vector.broadcast %1 : vector<1x10368xf32> to vector<2x10368xf32>
    %3 = arith.addf %0, %2 : vector<2x10368xf32>
    %c0_3 = arith.constant 0 : index
    %c0_4 = arith.constant 0 : index
    %4 = vector.load %arg3[%c0_3, %c0_4] : memref<2x10368xf32, #tpu.memory_space<vmem>>, vector<2x10368xf32>
    tpu.vector_store %arg3[%c0_3, %c0_4], %3 {strides = array<i32>} : memref<2x10368xf32, #tpu.memory_space<vmem>>, vector<2x10368xf32>,
    return
  }
  func.func @transform_0(%arg0: i32) -> (i32, i32) {
    %c0_i32 = arith.constant 0 : i32
    %c0_i32_0 = arith.constant 0 : i32
    return %arg0, %c0_i32 : i32, i32
  }
  func.func @transform_1(%arg0: i32) -> (i32, i32) {
    %c0_i32 = arith.constant 0 : i32
    %c0_i32_0 = arith.constant 0 : i32
    %c0_i32_1 = arith.constant 0 : i32
    return %c0_i32, %c0_i32_0 : i32, i32
  }
  func.func @transform_2(%arg0: i32) -> (i32, i32) {
    %c0_i32 = arith.constant 0 : i32
    %c0_i32_0 = arith.constant 0 : i32
    return %arg0, %c0_i32 : i32, i32
  }
}

</mosaic_0001>

<bundles_post_ra>
// kernel: tpu_custom_call.1
= control target key start
LH: loop header
LB: loop body
LE: loop exit
PB: predicated region body
PF: predicated region fallthrough
CT: control target
= control target key end

     0   :  { %7 = vsyncpa [#allocation3], 0  ;;  %s1100_s0 = inlined_call_operand.hbm [shape: f32[2,10368], index: 0, kind: input, shape index: {}]   ;;  %s1101_s1 = inlined_call_operand.hbm [shape: f32[1,10368], index: 1, kind: input, shape index: {}]   ;;  %s1102_s2 = inlined_call_operand.hbm [shape: f32[2,10368], index: 2, kind: output, shape index: {}]  }
   0x1   :  { %8 = vsyncpa [#allocation6], 0 }
   0x2   :  { %9 = vsyncpa [#allocation4], 0  ;;  %s906_s9 = smov [#allocation2]   ;;  %s907_s11 = smov [#allocation5]  }
   0x3   :  { %s16_s10 = sshll.u32 %s906_s9, 4  ;;  %s26_s12 = sshll.u32 %s907_s11, 4  ;;  %s17_s10 = int_to_ptr.vmem [resolvable:$true] %s16_s10  ;;  %s27_s12 = int_to_ptr.vmem [resolvable:$true] %s26_s12 }
   0x4   :  { %s834_s15 = scalar_lea.hbm %s1100_s0, 2592 }
   0x5   :  { %p835_p0 = scmp.ne.s32.totalorder %s1100_s0, %s834_s15  ;;  %p838_p1 = scmp.lt.u32.totalorder %s834_s15, %s1100_s0 }
   0x7   :  { %p840_p2 = pnand %p838_p1, %p835_p0 }
   0x9   :  { %843 = shalt.err (!%p840_p2)
}
   0xa   :  { %s844_s20 = scalar_lea.vmem %s17_s10, 2592  ;;  %p849_p4 = scmp.lt.s32.totalorder %s17_s10, %s17_s10 }
   0xb   :  { %p845_p3 = scmp.ne.s32.totalorder %s17_s10, %s844_s20  ;;  %p850_p5 = scmp.lt.s32.totalorder %s844_s20, %s844_s20 }
   0xd   :  { %p851_p6 = por %p850_p5, %p849_p4 }
   0xf   :  { %p852_p7 = pnand %p851_p6, %p845_p3 }
  0x11   :  { %855 = shalt.err (!%p852_p7)
}
  0x12   :  { %19 = dma.hbm_to_vmem [thread:$0]  %s1100_s0, 2592, %s17_s10, [#allocation3]  }
  0x13   :  { %s856_s25 = scalar_lea.hbm %s1101_s1, 1296 }
  0x14   :  { %p857_p8 = scmp.ne.s32.totalorder %s1101_s1, %s856_s25  ;;  %p860_p9 = scmp.lt.u32.totalorder %s856_s25, %s1101_s1 }
  0x16   :  { %p862_p10 = pnand %p860_p9, %p857_p8 }
  0x18   :  { %865 = shalt.err (!%p862_p10)
}
  0x19   :  { %s866_s30 = scalar_lea.vmem %s27_s12, 1296  ;;  %s870_s3 = scalar_lea.vmem %s27_s12, 1312 }
  0x1a   :  { %p867_p11 = scmp.ne.s32.totalorder %s27_s12, %s866_s30  ;;  %p871_p12 = scmp.lt.s32.totalorder %s27_s12, %s27_s12 }
  0x1b   :  { %p872_p13 = scmp.lt.s32.totalorder %s870_s3, %s866_s30 }
  0x1d   :  { %p873_p0 = por %p872_p13, %p871_p12 }
  0x1f   :  { %p874_p1 = pnand %p873_p0, %p867_p11 }
  0x21   :  { %877 = shalt.err (!%p874_p1)
}
  0x22   :  { %29 = dma.hbm_to_vmem [thread:$0]  %s1101_s1, 1296, %s27_s12, [#allocation6]  }
  0x23   :  { %900 = dma.done.wait [#allocation3], 2592  }
  0x24   :  { %901 = vsyncadd [#allocation3], 4294964704 }
  0x25   :  { %902 = dma.done.wait [#allocation6], 1296  }
  0x26   :  { %903 = vsyncadd [#allocation6], 4294966000  ;;  %v79_v0 = vlaneseq  ;;  %v908_v1 = vmov 1983009808   ;;  %v57_v13 = vld [vmem:[#allocation5] sm:$0xff]  ;;  %v58_v19 = vld [vmem:[#allocation5 + $0x8] sm:$0xff] }
  0x27   :  { %v406_v2 = vunpack.c.l.s4 %v908_v1  ;;  %v59_v36 = vld [vmem:[#allocation5 + $0x10] sm:$0xff]  ;;  %v36_v37 = vld [vmem:[#allocation2] sm:$0xff]  ;;  %v37_v43 = vld [vmem:[#allocation2 + $0x8] sm:$0xff]  ;;  %s909_s1 = smov [#allocation7]  }
  0x28   :  { %v80_v3 = vshrl.u32 %v79_v0, 7  ;;  %v38_v52 = vld [vmem:[#allocation2 + $0x10] sm:$0xff]  ;;  %v60_v60 = vld [vmem:[#allocation5 + $0x18] sm:$0xff]  ;;  %s819_s5 = sshll.u32 %s909_s1, 4  ;;  %s820_s5 = int_to_ptr.vmem [resolvable:$true] %s819_s5 }
  0x29   :  { %v407_v4 = vunpack.c.0.s8 %v406_v2  ;;  %v39_v2 = vld [vmem:[#allocation2 + $0x18] sm:$0xff]  ;;  %s878_s6 = scalar_lea.vmem %s820_s5, 2592  ;;  %p883_p3 = scmp.lt.s32.totalorder %s820_s5, %s820_s5 }
  0x2a   :  { %v949_v5 = vsub.s32 0, %v80_v3  ;;  %v951_v6 = vsub.s32 1, %v80_v3  ;;  %v953_v7 = vsub.s32 2, %v80_v3  ;;  %v955_v8 = vsub.s32 3, %v80_v3  ;;  %p879_p2 = scmp.ne.s32.totalorder %s820_s5, %s878_s6  ;;  %p884_p4 = scmp.lt.s32.totalorder %s878_s6, %s878_s6 }
  0x2b   :  { %v957_v9 = vsub.s32 4, %v80_v3  ;;  %v959_v10 = vsub.s32 5, %v80_v3  ;;  %v961_v11 = vsub.s32 6, %v80_v3  ;;  %v963_v12 = vsub.s32 7, %v80_v3 }
  0x2c   :  { %v965_v14 = vsub.s32 %v407_v4, %v80_v3  ;;  %v82_v15 = vrot.slane %v57_v13, %v949_v5  ;;  %v86_v16 = vrot.slane %v57_v13, %v951_v6  ;;  %v90_v17 = vrot.slane %v57_v13, %v953_v7  ;;  %p885_p5 = por %p884_p4, %p883_p3 }
  0x2d   :  { %v94_v18 = vrot.slane %v57_v13, %v955_v8  ;;  %v98_v20 = vrot.slane %v57_v13, %v957_v9  ;;  %v102_v21 = vrot.slane %v57_v13, %v959_v10  ;;  %v106_v22 = vrot.slane %v57_v13, %v961_v11 }
  0x2e   :  { %v110_v23 = vrot.slane %v57_v13, %v963_v12  ;;  %v403_v24 = vcombine.low %v82_v15, %v86_v16  ;;  %v114_v26 = vrot.slane %v58_v19, %v949_v5  ;;  %v118_v27 = vrot.slane %v58_v19, %v951_v6  ;;  %p886_p6 = pnand %p885_p5, %p879_p2 }
  0x2f   :  { %v404_v25 = vcombine.low %v90_v17, %v94_v18  ;;  %v420_v28 = vcombine.low %v98_v20, %v102_v21  ;;  %v122_v30 = vrot.slane %v58_v19, %v953_v7  ;;  %v126_v31 = vrot.slane %v58_v19, %v955_v8 }
  0x30   :  { %v421_v29 = vcombine.low %v106_v22, %v110_v23  ;;  %v411_v32 = vrot.slane %v403_v24, %v965_v14  ;;  %v437_v34 = vcombine.low %v114_v26, %v118_v27  ;;  %v130_v35 = vrot.slane %v58_v19, %v957_v9  ;;  %v61_v23 = vld [vmem:[#allocation5 + $0x20] sm:$0xff] }
  0x31   :  { %v418_v33 = vrot.slane %v404_v25, %v965_v14  ;;  %v428_v38 = vrot.slane %v420_v28, %v965_v14  ;;  %v438_v40 = vcombine.low %v122_v30, %v126_v31  ;;  %v134_v41 = vrot.slane %v58_v19, %v959_v10  ;;  %v40_v25 = vld [vmem:[#allocation2 + $0x20] sm:$0xff] }
  0x32   :  { %v435_v39 = vrot.slane %v421_v29, %v965_v14  ;;  %v445_v44 = vrot.slane %v437_v34, %v965_v14  ;;  %v138_v45 = vrot.slane %v58_v19, %v961_v11  ;;  %v142_v46 = vrot.slane %v58_v19, %v963_v12 }
  0x33   :  { %v419_v42 = vcombine.low %v411_v32, %v418_v33  ;;  %v452_v48 = vrot.slane %v438_v40, %v965_v14  ;;  %v454_v49 = vcombine.low %v130_v35, %v134_v41  ;;  %v146_v50 = vrot.slane %v59_v36, %v949_v5  ;;  %v41_v33 = vld [vmem:[#allocation2 + $0x28] sm:$0xff] }
  0x34   :  { %v436_v47 = vcombine.low %v428_v38, %v435_v39  ;;  %v455_v53 = vcombine.low %v138_v45, %v142_v46  ;;  %v150_v54 = vrot.slane %v59_v36, %v951_v6  ;;  %v154_v55 = vrot.slane %v59_v36, %v953_v7  ;;  %v62_v46 = vld [vmem:[#allocation5 + $0x28] sm:$0xff] }
  0x35   :  { %v771_v51 = vadd.f32 %v419_v42, %v36_v37  ;;  %v453_v57 = vcombine.low %v445_v44, %v452_v48  ;;  %v462_v58 = vrot.slane %v454_v49, %v965_v14  ;;  %v158_v59 = vrot.slane %v59_v36, %v955_v8  ;;  %v42_v48 = vld [vmem:[#allocation2 + $0x30] sm:$0xff] }
  0x36   :  { %v772_v56 = vadd.f32 %v436_v47, %v37_v43  ;;  %v469_v61 = vrot.slane %v455_v53, %v965_v14  ;;  %v471_v62 = vcombine.low %v146_v50, %v150_v54  ;;  %v162_v63 = vrot.slane %v59_v36, %v957_v9 }
  0x37   :  { %792 = vst [vmem:[#allocation7] sm:$0xff] %v771_v51  ;;  %v166_v0 = vrot.slane %v59_v36, %v959_v10  ;;  %v773_v1 = vadd.f32 %v453_v57, %v38_v52  ;;  %v472_v3 = vcombine.low %v154_v55, %v158_v59  ;;  %v170_v4 = vrot.slane %v59_v36, %v961_v11 }
  0x38   :  { %793 = vst [vmem:[#allocation7 + $0x8] sm:$0xff] %v772_v56  ;;  %v174_v13 = vrot.slane %v59_v36, %v963_v12  ;;  %v470_v15 = vcombine.low %v462_v58, %v469_v61  ;;  %v479_v16 = vrot.slane %v471_v62, %v965_v14  ;;  %v178_v18 = vrot.slane %v60_v60, %v949_v5  ;;  %v43_v56 = vld [vmem:[#allocation2 + $0x38] sm:$0xff] }
  0x39   :  { %v488_v17 = vcombine.low %v162_v63, %v166_v0  ;;  %794 = vst [vmem:[#allocation7 + $0x10] sm:$0xff] %v773_v1  ;;  %v486_v19 = vrot.slane %v472_v3, %v965_v14  ;;  %v182_v21 = vrot.slane %v60_v60, %v951_v6  ;;  %v186_v22 = vrot.slane %v60_v60, %v953_v7 }
  0x3a   :  { %v489_v20 = vcombine.low %v170_v4, %v174_v13  ;;  %v774_v24 = vadd.f32 %v470_v15, %v39_v2  ;;  %v190_v27 = vrot.slane %v60_v60, %v955_v8  ;;  %v194_v28 = vrot.slane %v60_v60, %v957_v9  ;;  %v63_v13 = vld [vmem:[#allocation5 + $0x30] sm:$0xff] }
  0x3b   :  { %v496_v26 = vrot.slane %v488_v17, %v965_v14  ;;  %v487_v29 = vcombine.low %v479_v16, %v486_v19  ;;  %v505_v31 = vcombine.low %v178_v18, %v182_v21  ;;  %v198_v32 = vrot.slane %v60_v60, %v959_v10  ;;  %v44_v16 = vld [vmem:[#allocation2 + $0x40] sm:$0xff] }
  0x3c   :  { %v503_v30 = vrot.slane %v489_v20, %v965_v14  ;;  %795 = vst [vmem:[#allocation7 + $0x18] sm:$0xff] %v774_v24  ;;  %v506_v34 = vcombine.low %v186_v22, %v190_v27  ;;  %v202_v35 = vrot.slane %v60_v60, %v961_v11  ;;  %v206_v36 = vrot.slane %v60_v60, %v963_v12  ;;  %v45_v24 = vld [vmem:[#allocation2 + $0x48] sm:$0xff] }
  0x3d   :  { %v210_v37 = vrot.slane %v61_v23, %v949_v5  ;;  %v775_v38 = vadd.f32 %v487_v29, %v40_v25  ;;  %v513_v40 = vrot.slane %v505_v31, %v965_v14  ;;  %v522_v41 = vcombine.low %v194_v28, %v198_v32 }
  0x3e   :  { %v504_v39 = vcombine.low %v496_v26, %v503_v30  ;;  %v520_v42 = vrot.slane %v506_v34, %v965_v14  ;;  %v523_v43 = vcombine.low %v202_v35, %v206_v36  ;;  %v214_v44 = vrot.slane %v61_v23, %v951_v6 }
  0x3f   :  { %v218_v45 = vrot.slane %v61_v23, %v953_v7  ;;  %796 = vst [vmem:[#allocation7 + $0x20] sm:$0xff] %v775_v38  ;;  %v530_v49 = vrot.slane %v522_v41, %v965_v14  ;;  %v222_v50 = vrot.slane %v61_v23, %v955_v8  ;;  %v226_v51 = vrot.slane %v61_v23, %v957_v9 }
  0x40   :  { %v776_v47 = vadd.f32 %v504_v39, %v41_v33  ;;  %v521_v52 = vcombine.low %v513_v40, %v520_v42  ;;  %v537_v53 = vrot.slane %v523_v43, %v965_v14  ;;  %v539_v54 = vcombine.low %v210_v37, %v214_v44  ;;  %v64_v37 = vld [vmem:[#allocation5 + $0x38] sm:$0xff]  ;;  %v46_v39 = vld [vmem:[#allocation2 + $0x50] sm:$0xff] }
  0x41   :  { %v230_v55 = vrot.slane %v61_v23, %v959_v10  ;;  %v540_v57 = vcombine.low %v218_v45, %v222_v50  ;;  %v234_v58 = vrot.slane %v61_v23, %v961_v11  ;;  %v238_v59 = vrot.slane %v61_v23, %v963_v12 }
  0x42   :  { %797 = vst [vmem:[#allocation7 + $0x28] sm:$0xff] %v776_v47  ;;  %v242_v60 = vrot.slane %v62_v46, %v949_v5  ;;  %v777_v61 = vadd.f32 %v521_v52, %v42_v48  ;;  %v538_v62 = vcombine.low %v530_v49, %v537_v53  ;;  %v547_v63 = vrot.slane %v539_v54, %v965_v14  ;;  %v47_v47 = vld [vmem:[#allocation2 + $0x58] sm:$0xff] }
  0x43   :  { %v556_v0 = vcombine.low %v226_v51, %v230_v55  ;;  %v554_v1 = vrot.slane %v540_v57, %v965_v14  ;;  %v557_v2 = vcombine.low %v234_v58, %v238_v59  ;;  %v246_v3 = vrot.slane %v62_v46, %v951_v6 }
  0x44   :  { %v250_v4 = vrot.slane %v62_v46, %v953_v7  ;;  %798 = vst [vmem:[#allocation7 + $0x30] sm:$0xff] %v777_v61  ;;  %v778_v15 = vadd.f32 %v538_v62, %v43_v56  ;;  %v254_v18 = vrot.slane %v62_v46, %v955_v8  ;;  %v258_v19 = vrot.slane %v62_v46, %v957_v9  ;;  %v48_v62 = vld [vmem:[#allocation2 + $0x60] sm:$0xff] }
  0x45   :  { %v564_v17 = vrot.slane %v556_v0, %v965_v14  ;;  %v555_v20 = vcombine.low %v547_v63, %v554_v1  ;;  %v571_v21 = vrot.slane %v557_v2, %v965_v14  ;;  %v573_v22 = vcombine.low %v242_v60, %v246_v3  ;;  %v65_v60 = vld [vmem:[#allocation5 + $0x40] sm:$0xff] }
  0x46   :  { %v262_v23 = vrot.slane %v62_v46, %v959_v10  ;;  %799 = vst [vmem:[#allocation7 + $0x38] sm:$0xff] %v778_v15  ;;  %v574_v25 = vcombine.low %v250_v4, %v254_v18  ;;  %v266_v26 = vrot.slane %v62_v46, %v961_v11  ;;  %v270_v27 = vrot.slane %v62_v46, %v963_v12  ;;  %v49_v15 = vld [vmem:[#allocation2 + $0x68] sm:$0xff] }
  0x47   :  { %v274_v28 = vrot.slane %v63_v13, %v949_v5  ;;  %v779_v29 = vadd.f32 %v555_v20, %v44_v16  ;;  %v572_v30 = vcombine.low %v564_v17, %v571_v21  ;;  %v581_v31 = vrot.slane %v573_v22, %v965_v14 }
  0x48   :  { %v590_v32 = vcombine.low %v258_v19, %v262_v23  ;;  %v588_v33 = vrot.slane %v574_v25, %v965_v14  ;;  %v591_v34 = vcombine.low %v266_v26, %v270_v27  ;;  %v278_v35 = vrot.slane %v63_v13, %v951_v6 }
  0x49   :  { %v282_v36 = vrot.slane %v63_v13, %v953_v7  ;;  %800 = vst [vmem:[#allocation7 + $0x40] sm:$0xff] %v779_v29  ;;  %v780_v38 = vadd.f32 %v572_v30, %v45_v24  ;;  %v286_v41 = vrot.slane %v63_v13, %v955_v8  ;;  %v290_v42 = vrot.slane %v63_v13, %v957_v9  ;;  %v50_v30 = vld [vmem:[#allocation2 + $0x70] sm:$0xff] }
  0x4a   :  { %v598_v40 = vrot.slane %v590_v32, %v965_v14  ;;  %v589_v43 = vcombine.low %v581_v31, %v588_v33  ;;  %v605_v44 = vrot.slane %v591_v34, %v965_v14  ;;  %v607_v45 = vcombine.low %v274_v28, %v278_v35  ;;  %v66_v28 = vld [vmem:[#allocation5 + $0x48] sm:$0xff] }
  0x4b   :  { %v294_v46 = vrot.slane %v63_v13, %v959_v10  ;;  %801 = vst [vmem:[#allocation7 + $0x48] sm:$0xff] %v780_v38  ;;  %v608_v48 = vcombine.low %v282_v36, %v286_v41  ;;  %v298_v49 = vrot.slane %v63_v13, %v961_v11  ;;  %v302_v50 = vrot.slane %v63_v13, %v963_v12  ;;  %v51_v38 = vld [vmem:[#allocation2 + $0x78] sm:$0xff] }
  0x4c   :  { %v306_v51 = vrot.slane %v64_v37, %v949_v5  ;;  %v781_v52 = vadd.f32 %v589_v43, %v46_v39  ;;  %v606_v53 = vcombine.low %v598_v40, %v605_v44  ;;  %v615_v54 = vrot.slane %v607_v45, %v965_v14 }
  0x4d   :  { %v624_v55 = vcombine.low %v290_v42, %v294_v46  ;;  %v622_v56 = vrot.slane %v608_v48, %v965_v14  ;;  %v625_v57 = vcombine.low %v298_v49, %v302_v50  ;;  %v310_v58 = vrot.slane %v64_v37, %v951_v6 }
  0x4e   :  { %v314_v59 = vrot.slane %v64_v37, %v953_v7  ;;  %802 = vst [vmem:[#allocation7 + $0x50] sm:$0xff] %v781_v52  ;;  %v782_v61 = vadd.f32 %v606_v53, %v47_v47  ;;  %v318_v0 = vrot.slane %v64_v37, %v955_v8  ;;  %v322_v1 = vrot.slane %v64_v37, %v957_v9  ;;  %v52_v53 = vld [vmem:[#allocation2 + $0x80] sm:$0xff] }
  0x4f   :  { %v632_v63 = vrot.slane %v624_v55, %v965_v14  ;;  %v623_v2 = vcombine.low %v615_v54, %v622_v56  ;;  %v639_v3 = vrot.slane %v625_v57, %v965_v14  ;;  %v641_v4 = vcombine.low %v306_v51, %v310_v58  ;;  %v829_v51 = vld [vmem:[#allocation5 + $0x50] ss:$0 sm:$0xff] }
  0x50   :  { %v326_v13 = vrot.slane %v64_v37, %v959_v10  ;;  %803 = vst [vmem:[#allocation7 + $0x58] sm:$0xff] %v782_v61  ;;  %v642_v16 = vcombine.low %v314_v59, %v318_v0  ;;  %v330_v17 = vrot.slane %v64_v37, %v961_v11  ;;  %v334_v18 = vrot.slane %v64_v37, %v963_v12 }
  0x51   :  { %v338_v19 = vrot.slane %v65_v60, %v949_v5  ;;  %v783_v20 = vadd.f32 %v623_v2, %v48_v62  ;;  %v640_v21 = vcombine.low %v632_v63, %v639_v3  ;;  %v649_v22 = vrot.slane %v641_v4, %v965_v14 }
  0x52   :  { %v658_v23 = vcombine.low %v322_v1, %v326_v13  ;;  %v656_v24 = vrot.slane %v642_v16, %v965_v14  ;;  %v659_v25 = vcombine.low %v330_v17, %v334_v18  ;;  %v342_v26 = vrot.slane %v65_v60, %v951_v6  ;;  %v54_v13 = vld [vmem:[#allocation2 + $0x90] sm:$0xff] }
  0x53   :  { %v346_v27 = vrot.slane %v65_v60, %v953_v7  ;;  %804 = vst [vmem:[#allocation7 + $0x60] sm:$0xff] %v783_v20  ;;  %v784_v29 = vadd.f32 %v640_v21, %v49_v15  ;;  %v350_v32 = vrot.slane %v65_v60, %v955_v8  ;;  %v354_v33 = vrot.slane %v65_v60, %v957_v9 }
  0x54   :  { %v666_v31 = vrot.slane %v658_v23, %v965_v14  ;;  %v657_v34 = vcombine.low %v649_v22, %v656_v24  ;;  %v673_v35 = vrot.slane %v659_v25, %v965_v14  ;;  %v675_v36 = vcombine.low %v338_v19, %v342_v26 }
  0x55   :  { %v358_v37 = vrot.slane %v65_v60, %v959_v10  ;;  %805 = vst [vmem:[#allocation7 + $0x68] sm:$0xff] %v784_v29  ;;  %v676_v39 = vcombine.low %v346_v27, %v350_v32  ;;  %v362_v40 = vrot.slane %v65_v60, %v961_v11  ;;  %v366_v41 = vrot.slane %v65_v60, %v963_v12  ;;  %v56_v60 = vld [vmem:[#allocation2 + $0xa0] sm:$0x3] }
  0x56   :  { %v370_v42 = vrot.slane %v66_v28, %v949_v5  ;;  %v785_v43 = vadd.f32 %v657_v34, %v50_v30  ;;  %v674_v44 = vcombine.low %v666_v31, %v673_v35  ;;  %v683_v45 = vrot.slane %v675_v36, %v965_v14 }
  0x57   :  { %v692_v46 = vcombine.low %v354_v33, %v358_v37  ;;  %v690_v47 = vrot.slane %v676_v39, %v965_v14  ;;  %v693_v48 = vcombine.low %v362_v40, %v366_v41  ;;  %v374_v49 = vrot.slane %v66_v28, %v951_v6  ;;  %v53_v6 = vld [vmem:[#allocation2 + $0x88] sm:$0xff] }
  0x58   :  { %v378_v50 = vrot.slane %v66_v28, %v953_v7  ;;  %806 = vst [vmem:[#allocation7 + $0x70] sm:$0xff] %v785_v43  ;;  %v786_v52 = vadd.f32 %v674_v44, %v51_v38  ;;  %v382_v5 = vrot.slane %v66_v28, %v955_v8  ;;  %v386_v55 = vrot.slane %v66_v28, %v957_v9 }
  0x59   :  { %v700_v54 = vrot.slane %v692_v46, %v965_v14  ;;  %v691_v56 = vcombine.low %v683_v45, %v690_v47  ;;  %v707_v57 = vrot.slane %v693_v48, %v965_v14  ;;  %v709_v58 = vcombine.low %v370_v42, %v374_v49 }
  0x5a   :  { %v390_v59 = vrot.slane %v66_v28, %v959_v10  ;;  %807 = vst [vmem:[#allocation7 + $0x78] sm:$0xff] %v786_v52  ;;  %v710_v7 = vcombine.low %v378_v50, %v382_v5  ;;  %v394_v61 = vrot.slane %v66_v28, %v961_v11  ;;  %v398_v62 = vrot.slane %v66_v28, %v963_v12  ;;  %v55_v12 = vld [vmem:[#allocation2 + $0x98] sm:$0xff] }
  0x5b   :  { %v749_v63 = vrot.slane %v829_v51, %v965_v14  ;;  %v787_v0 = vadd.f32 %v691_v56, %v52_v53  ;;  %v708_v8 = vcombine.low %v700_v54, %v707_v57  ;;  %v717_v9 = vrot.slane %v709_v58, %v965_v14 }
  0x5c   :  { %v726_v1 = vcombine.low %v386_v55, %v390_v59  ;;  %v724_v2 = vrot.slane %v710_v7, %v965_v14  ;;  %v727_v3 = vcombine.low %v394_v61, %v398_v62 }
  0x5d   :  { %v791_v4 = vadd.f32 %v749_v63, %v56_v60  ;;  %808 = vst [vmem:[#allocation7 + $0x80] sm:$0xff] %v787_v0  ;;  %v788_v10 = vadd.f32 %v708_v8, %v53_v6 }
  0x5e   :  { %v734_v15 = vrot.slane %v726_v1, %v965_v14  ;;  %v725_v16 = vcombine.low %v717_v9, %v724_v2  ;;  %v741_v11 = vrot.slane %v727_v3, %v965_v14 }
  0x5f   :  { %812 = vst [vmem:[#allocation7 + $0xa0] sm:$0x3] %v791_v4  ;;  %809 = vst [vmem:[#allocation7 + $0x88] sm:$0xff] %v788_v10 }
  0x60   :  { %v789_v17 = vadd.f32 %v725_v16, %v54_v13  ;;  %v742_v18 = vcombine.low %v734_v15, %v741_v11 }
  0x62   :  { %810 = vst [vmem:[#allocation7 + $0x90] sm:$0xff] %v789_v17  ;;  %v790_v19 = vadd.f32 %v742_v18, %v55_v12 }
  0x64   :  { %811 = vst [vmem:[#allocation7 + $0x98] sm:$0xff] %v790_v19 }
  0x65   :  { %889 = shalt.err (!%p886_p6)
}
  0x66   :  { %s890_s9 = scalar_lea.hbm %s1102_s2, 2592 }
  0x67   :  { %p891_p7 = scmp.ne.s32.totalorder %s1102_s2, %s890_s9  ;;  %p894_p8 = scmp.lt.u32.totalorder %s890_s9, %s1102_s2 }
  0x69   :  { %p896_p9 = pnand %p894_p8, %p891_p7 }
  0x6b   :  { %899 = shalt.err (!%p896_p9)
}
  0x6c   :  { %822 = dma.vmem_to_hbm [thread:$0]  %s820_s5, 2592, %s1102_s2, [#allocation4]  }
  0x6d   :  { %904 = dma.done.wait [#allocation4], 2592  }
  0x6e   :  { %905 = vsyncadd [#allocation4], 4294964704 }
  0x6f   :  { %826 = vsyncpa [#allocation3], 1 }
  0x70   :  { %827 = vsyncpa [#allocation6], 1 }
  0x71   :  { %828 = vsyncpa [#allocation4], 1 }

</bundles_post_ra>
